<compile_context>
chip_gen: v5e
topology: v5e:2x2
jax: 0.10.0
libtpu: 0.0.40
codegen_flags: <defaults>
</compile_context>

<pallas_src>
import functools

import jax
import jax.numpy as jnp
from jax import lax
from jax.experimental import pallas as pl
from jax.experimental.pallas import tpu as pltpu

BN_EPS = 1e-5


# --------------------------------------------------------------------------
# Fused SNXBlock kernel: (Bt images) x (one row-chunk) per grid step.
# --------------------------------------------------------------------------
def _snx_kernel(x_ref, w1sc_ref, b1sc_ref, w2_ref, b2_ref, w3_ref, b3_ref,
                w4_ref, b4_ref, mask_ref, o_ref, *, c_mid, has_shortcut_conv):
    # x_ref   : (Bt, Cin, chunk)          channels on sublanes, pixels on lanes
    # w1sc_ref: (c_mid[+c_out], Cin)      BN-folded [squeeze conv1 ; shortcut]
    # w2_ref  : (c_mid2, c_mid)
    # w3_ref  : (c_mid, 3*c_mid2)         (1,3) conv, taps flattened into K
    # w4_ref  : (c_out, c_mid)
    # bX_ref  : (c, 1) f32                BN-folded per-channel bias
    # mask_ref: (2, chunk) f32            row-edge masks (left-valid, right-valid)
    f32 = jnp.float32
    cdt = x_ref.dtype                      # matmul operand dtype (f32 or bf16)
    chunk = x_ref.shape[-1]
    ml = mask_ref[0:1, :]                  # (1, chunk)
    mr = mask_ref[1:2, :]

    for i in range(x_ref.shape[0]):        # static unrolled loop over Bt images
        x = x_ref[i]                       # (Cin, chunk)

        # squeeze[0:3] 1x1 conv + shortcut conv share RHS x -> ONE matmul.
        y = jnp.dot(w1sc_ref[...], x, preferred_element_type=f32) + b1sc_ref[...]
        t = jnp.maximum(y[:c_mid], 0.0)                    # (c_mid, chunk) f32
        if has_shortcut_conv:
            sc = y[c_mid:]                                 # (c_out, chunk) f32
        else:
            sc = x.astype(f32)                             # Identity shortcut

        # squeeze[3:6]: 1x1 conv + BN + ReLU
        t = jnp.dot(w2_ref[...], t.astype(cdt), preferred_element_type=f32)
        t = jnp.maximum(t + b2_ref[...], 0.0)              # (c_mid2, chunk) f32

        # squeeze[6:9]: (1,3) conv, padding (0,1), + BN + ReLU.
        # W-neighbours are adjacent lanes; a lane roll (XLU slot, cheap) plus
        # precomputed row-edge masks gives the zero-padded taps.  The three
        # taps are stacked along sublanes and fed to ONE MXU matmul.
        left = ml * pltpu.roll(t, shift=1, axis=1)          # t[w-1]
        right = mr * pltpu.roll(t, shift=chunk - 1, axis=1)  # t[w+1]
        taps = jnp.concatenate([left, t, right], axis=0).astype(cdt)
        t = jnp.dot(w3_ref[...], taps, preferred_element_type=f32) + b3_ref[...]
        t = jnp.maximum(t, 0.0)                             # (c_mid, chunk) f32

        # squeeze[9:12]: 1x1 conv + BN + ReLU
        t = jnp.dot(w4_ref[...], t.astype(cdt), preferred_element_type=f32)
        t = jnp.maximum(t + b4_ref[...], 0.0)               # (c_out, chunk) f32

        # residual: out = relu(t + relu(shortcut)) ; lane-dense store
        o_ref[i] = jnp.maximum(t + jnp.maximum(sc, 0.0), 0.0).astype(o_ref.dtype)


# --------------------------------------------------------------------------
# Tiling heuristic: batch block + row chunk.
# --------------------------------------------------------------------------
def _pick_tiles(B, Cin, Cout, H, W, itemsize,
                per_image_budget=4 << 20, per_step_target=512 << 10):
    HW = H * W
    # Row chunk: whole image unless a single image's in+out block is large.
    # Chunks are whole rows and rows*W must be a multiple of 128 (BlockSpec
    # (8,128) rule) unless the chunk is the full H*W axis.
    hc = H
    if (Cin + Cout) * HW * itemsize > per_image_budget:
        cands = [c for c in range(1, H)
                 if H % c == 0 and (c * W) % 128 == 0
                 and (Cin + Cout) * c * W * itemsize <= per_image_budget]
        if cands:
            hc = max(cands)
    n_chunks = H // hc
    # Batch block: amortize the ~0.35us/step overhead with bigger DMAs, but
    # keep >=2 grid steps so both v7x TensorCores get work.
    per_img_bytes = (Cin + Cout) * hc * W * itemsize
    cap = max(1, per_step_target // max(per_img_bytes, 1))
    if n_chunks == 1:
        cap = min(cap, max(1, B // 2))
    bt = 1
    for d in range(1, B + 1):
        if B % d == 0 and d <= cap:
            bt = d
    return bt, hc


# --------------------------------------------------------------------------
# Wrapper: NCHW in / NCHW out, single pallas_call for the whole block.
# --------------------------------------------------------------------------
def snx_block(x_nchw, params, stride=1, operand_dtype=None):
    B, Cin, H, W = x_nchw.shape
    if stride != 1:
        # 1x1 convs with stride s only read every s-th pixel; slicing once up
        # front is equivalent and keeps the fused kernel stride-1.
        x_nchw = x_nchw[:, :, ::stride, ::stride]
        H, W = x_nchw.shape[2], x_nchw.shape[3]
    HW = H * W
    cdt = jnp.dtype(operand_dtype) if operand_dtype is not None else x_nchw.dtype
    x = x_nchw.reshape(B, Cin, HW).astype(cdt)            # contiguous -> free

    has_sc = "wsc" in params
    c_mid = params["w1"].shape[0]
    c_mid2 = params["w2"].shape[0]
    c_out = params["w4"].shape[0]

    # Merge squeeze-conv1 + shortcut conv (shared RHS x -> one MXU matmul).
    if has_sc:
        w1sc = jnp.concatenate([params["w1"], params["wsc"]], axis=0)
        b1sc = jnp.concatenate([params["b1"], params["bsc"]], axis=0)
    else:
        w1sc, b1sc = params["w1"], params["b1"]
    c1 = w1sc.shape[0]

    # Flatten (1,3)-conv taps into the contraction dim: (3,c_mid,c_mid2) ->
    # (c_mid, 3*c_mid2), ordered [left | center | right] to match the kernel.
    w3f = jnp.transpose(params["w3"], (1, 0, 2)).reshape(c_mid, 3 * c_mid2)

    bt, hc = _pick_tiles(B, Cin, c_out, H, W, jnp.dtype(cdt).itemsize)
    chunk = hc * W
    n_chunks = H // hc

    # Row-edge masks for the (1,3) conv; the pattern repeats every W, so one
    # chunk's worth (constant across grid steps) suffices.  Kept in f32 so all
    # post-matmul elementwise math stays f32 (v5e has no bf16 VPU path).
    col = jnp.arange(chunk, dtype=jnp.int32) % W
    masks = jnp.stack([(col != 0), (col != W - 1)]).astype(jnp.float32)

    cast = lambda a: a.astype(cdt)
    f32 = lambda a: a.astype(jnp.float32)
    args = [x,
            cast(w1sc), f32(b1sc),
            cast(params["w2"]), f32(params["b2"]),
            cast(w3f), f32(params["b3"]),
            cast(params["w4"]), f32(params["b4"]),
            masks]

    def const(shape):
        return pl.BlockSpec(shape, lambda b, h: (0,) * len(shape))

    in_specs = [
        pl.BlockSpec((bt, Cin, chunk), lambda b, h: (b, 0, h)),
        const((c1, Cin)), const((c1, 1)),
        const((c_mid2, c_mid)), const((c_mid2, 1)),
        const((c_mid, 3 * c_mid2)), const((c_mid, 1)),
        const((c_out, c_mid)), const((c_out, 1)),
        const((2, chunk)),
    ]

    kernel = functools.partial(_snx_kernel, c_mid=c_mid, has_shortcut_conv=has_sc)
    out = pl.pallas_call(
        kernel,
        out_shape=jax.ShapeDtypeStruct((B, c_out, HW), cdt),
        grid=(B // bt, n_chunks),
        in_specs=in_specs,
        out_specs=pl.BlockSpec((bt, c_out, chunk), lambda b, h: (b, 0, h)),
        compiler_params=pltpu.CompilerParams(
            dimension_semantics=("parallel", "parallel")),
    )(*args)
    return out.reshape(B, c_out, H, W)


# --------------------------------------------------------------------------
# Deterministic parameters (shapes per the module __init__), BN folded.
# --------------------------------------------------------------------------
def init_params(key, in_channels, out_channels, stride):
    if stride == 2:
        reduction = 1.0
    elif in_channels > out_channels:
        reduction = 0.25
    else:
        reduction = 0.5
    c_mid = int(in_channels * reduction)
    c_mid2 = int(in_channels * reduction * 0.5)
    assert c_mid >= 1 and c_mid2 >= 1, "channel config collapses to zero width"

    keys = iter(jax.random.split(key, 32))

    def nrm(shape, s=0.4):
        return jax.random.normal(next(keys), shape, jnp.float32) * s

    def bn(c):
        gamma = 1.0 + nrm((c,), 0.05)
        beta = nrm((c,), 0.05)
        # eval-mode BN (mean=0, var=1): y = gamma/sqrt(1+eps) * x + beta
        return gamma / jnp.sqrt(1.0 + BN_EPS), beta

    def fold1x1(cout, cin):
        w = nrm((cout, cin))                      # PyTorch OI layout, 1x1 conv
        scale, beta = bn(cout)
        return w * scale[:, None], beta.reshape(cout, 1)

    p = {}
    p["w1"], p["b1"] = fold1x1(c_mid, in_channels)
    p["w2"], p["b2"] = fold1x1(c_mid2, c_mid)
    # (1,3) conv: PyTorch weight (c_mid, c_mid2, 1, 3) -> taps-first (3, c_mid, c_mid2)
    w3 = nrm((c_mid, c_mid2, 1, 3))
    s3, beta3 = bn(c_mid)
    p["w3"] = jnp.transpose(w3[:, :, 0, :], (2, 0, 1)) * s3[None, :, None]
    p["b3"] = beta3.reshape(c_mid, 1)
    p["w4"], p["b4"] = fold1x1(out_channels, c_mid)
    if stride == 2 or in_channels != out_channels:
        p["wsc"], p["bsc"] = fold1x1(out_channels, in_channels)
    return p


# --------------------------------------------------------------------------
# Pure-JAX reference (same folded-BN math) for a correctness self-check.
# --------------------------------------------------------------------------
def snx_block_reference(x_nchw, params, stride=1):
    x = x_nchw[:, :, ::stride, ::stride] if stride != 1 else x_nchw
    hi = lax.Precision.HIGHEST

    def conv1x1(v, w, b):
        return jnp.einsum("bchw,oc->bohw", v, w, precision=hi) + b.reshape(1, -1, 1, 1)

    t = jax.nn.relu(conv1x1(x, params["w1"], params["b1"]))
    t = jax.nn.relu(conv1x1(t, params["w2"], params["b2"]))
    tp = jnp.pad(t, ((0, 0), (0, 0), (0, 0), (1, 1)))
    t = (jnp.einsum("bchw,oc->bohw", tp[..., :-2], params["w3"][0], precision=hi)
         + jnp.einsum("bchw,oc->bohw", tp[..., 1:-1], params["w3"][1], precision=hi)
         + jnp.einsum("bchw,oc->bohw", tp[..., 2:], params["w3"][2], precision=hi)
         + params["b3"].reshape(1, -1, 1, 1))
    t = jax.nn.relu(t)
    t = jax.nn.relu(conv1x1(t, params["w4"], params["b4"]))
    sc = conv1x1(x, params["wsc"], params["bsc"]) if "wsc" in params else x
    return jax.nn.relu(t + jax.nn.relu(sc))


if __name__ == "__main__":
    key = jax.random.PRNGKey(0)

    # --- case 1: Cin != Cout -> shortcut is Conv2d + BatchNorm ---------------
    B, Cin, H, W = 2, 16, 16, 16
    Cout, stride = 32, 1
    kp, kx, kp2, kx2 = jax.random.split(key, 4)
    params = init_params(kp, Cin, Cout, stride)
    x = jax.random.normal(kx, (B, Cin, H, W), jnp.float32)

    ref = snx_block_reference(x, params, stride=stride)
    ref_max = float(jnp.max(jnp.abs(ref)))

    out = jax.block_until_ready(snx_block(x, params, stride=stride))
    assert out.shape == (B, Cout, H, W), out.shape
    assert bool(jnp.all(jnp.isfinite(out)))
    err = float(jnp.max(jnp.abs(out.astype(jnp.float32) - ref)))
    assert err <= 1e-2 * max(1.0, ref_max) + 1e-5, (err, ref_max)

    # bf16 operands (halved HBM traffic); accumulation/elementwise stay f32.
    out_bf = jax.block_until_ready(
        snx_block(x, params, stride=stride, operand_dtype=jnp.bfloat16))
    err_bf = float(jnp.max(jnp.abs(out_bf.astype(jnp.float32) - ref)))
    assert err_bf <= 5e-2 * max(1.0, ref_max) + 1e-3, (err_bf, ref_max)

    # --- case 2: Cin == Cout, stride 1 -> Identity shortcut ------------------
    Cin2 = Cout2 = 32
    params2 = init_params(kp2, Cin2, Cout2, 1)
    x2 = jax.random.normal(kx2, (B, Cin2, H, W), jnp.float32)
    ref2 = snx_block_reference(x2, params2, stride=1)
    out2 = jax.block_until_ready(snx_block(x2, params2, stride=1))
    err2 = float(jnp.max(jnp.abs(out2.astype(jnp.float32) - ref2)))
    ref2_max = float(jnp.max(jnp.abs(ref2)))
    assert err2 <= 1e-2 * max(1.0, ref2_max) + 1e-5, (err2, ref2_max)

    print("KERNEL_OK")
</pallas_src>

<mosaic_0001>
module attributes {stable_mosaic.version = 11 : i64} {
  func.func @_snx_kernel(%arg0: i32, %arg1: i32, %arg2: memref<1x16x256xf32, #tpu.memory_space<vmem>>, %arg3: memref<40x16xf32, #tpu.memory_space<vmem>>, %arg4: memref<40x1xf32, #tpu.memory_space<vmem>>, %arg5: memref<4x8xf32, #tpu.memory_space<vmem>>, %arg6: memref<4x1xf32, #tpu.memory_space<vmem>>, %arg7: memref<8x12xf32, #tpu.memory_space<vmem>>, %arg8: memref<8x1xf32, #tpu.memory_space<vmem>>, %arg9: memref<32x8xf32, #tpu.memory_space<vmem>>, %arg10: memref<32x1xf32, #tpu.memory_space<vmem>>, %arg11: memref<2x256xf32, #tpu.memory_space<vmem>>, %arg12: memref<1x32x256xf32, #tpu.memory_space<vmem>>) attributes {dimension_semantics = [#tpu.dimension_semantics<parallel>, #tpu.dimension_semantics<parallel>], iteration_bounds = array<i64: 2, 1>, scalar_prefetch = 0 : i64, scratch_operands = 0 : i64, tpu.core_type = #tpu.core_type<tc>, window_params = [{transform_indices = @transform_0, window_bounds = array<i64: 1, 16, 256>}, {pipeline_mode = #tpu.pipeline_mode<synchronous>, transform_indices = @transform_1, window_bounds = array<i64: 40, 16>}, {pipeline_mode = #tpu.pipeline_mode<synchronous>, transform_indices = @transform_2, window_bounds = array<i64: 40, 1>}, {pipeline_mode = #tpu.pipeline_mode<synchronous>, transform_indices = @transform_3, window_bounds = array<i64: 4, 8>}, {pipeline_mode = #tpu.pipeline_mode<synchronous>, transform_indices = @transform_4, window_bounds = array<i64: 4, 1>}, {pipeline_mode = #tpu.pipeline_mode<synchronous>, transform_indices = @transform_5, window_bounds = array<i64: 8, 12>}, {pipeline_mode = #tpu.pipeline_mode<synchronous>, transform_indices = @transform_6, window_bounds = array<i64: 8, 1>}, {pipeline_mode = #tpu.pipeline_mode<synchronous>, transform_indices = @transform_7, window_bounds = array<i64: 32, 8>}, {pipeline_mode = #tpu.pipeline_mode<synchronous>, transform_indices = @transform_8, window_bounds = array<i64: 32, 1>}, {pipeline_mode = #tpu.pipeline_mode<synchronous>, transform_indices = @transform_9, window_bounds = array<i64: 2, 256>}, {transform_indices = @transform_10, window_bounds = array<i64: 1, 32, 256>}]} {
    %c0 = arith.constant 0 : index
    %c0_0 = arith.constant 0 : index
    %0 = vector.load %arg11[%c0, %c0_0] : memref<2x256xf32, #tpu.memory_space<vmem>>, vector<1x256xf32>
    %c1 = arith.constant 1 : index
    %c0_1 = arith.constant 0 : index
    %1 = vector.load %arg11[%c1, %c0_1] : memref<2x256xf32, #tpu.memory_space<vmem>>, vector<1x256xf32>
    %c0_2 = arith.constant 0 : index
    %c0_3 = arith.constant 0 : index
    %c0_4 = arith.constant 0 : index
    %2 = vector.load %arg2[%c0_2, %c0_3, %c0_4] : memref<1x16x256xf32, #tpu.memory_space<vmem>>, vector<1x16x256xf32>
    %3 = vector.shape_cast %2 : vector<1x16x256xf32> to vector<16x256xf32>
    %c0_5 = arith.constant 0 : index
    %c0_6 = arith.constant 0 : index
    %4 = vector.load %arg3[%c0_5, %c0_6] : memref<40x16xf32, #tpu.memory_space<vmem>>, vector<40x16xf32>
    %cst = arith.constant dense<0.000000e+00> : vector<40x256xf32>
    %5 = tpu.matmul %4, %3, %cst {dimension_numbers = #tpu.dot_dimension_numbers<[1], [0], [0], [1], [0, 0, 1, 1], [], []>} : vector<40x16xf32>, vector<16x256xf32>, vector<40x256xf32> -> vector<40x256xf32>
    %c0_7 = arith.constant 0 : index
    %c0_8 = arith.constant 0 : index
    %6 = vector.load %arg4[%c0_7, %c0_8] : memref<40x1xf32, #tpu.memory_space<vmem>>, vector<40x1xf32>
    %7 = vector.broadcast %6 : vector<40x1xf32> to vector<40x256xf32>
    %8 = arith.addf %5, %7 : vector<40x256xf32>
    %9 = vector.extract_strided_slice %8 {offsets = [0, 0], sizes = [8, 256], strides = [1, 1]} : vector<40x256xf32> to vector<8x256xf32>
    %cst_9 = arith.constant 0.000000e+00 : f32
    %10 = vector.broadcast %cst_9 : f32 to vector<8x256xf32>
    %11 = arith.maximumf %9, %10 : vector<8x256xf32>
    %12 = vector.extract_strided_slice %8 {offsets = [8, 0], sizes = [32, 256], strides = [1, 1]} : vector<40x256xf32> to vector<32x256xf32>
    %c0_10 = arith.constant 0 : index
    %c0_11 = arith.constant 0 : index
    %13 = vector.load %arg5[%c0_10, %c0_11] : memref<4x8xf32, #tpu.memory_space<vmem>>, vector<4x8xf32>
    %cst_12 = arith.constant dense<0.000000e+00> : vector<4x256xf32>
    %14 = tpu.matmul %13, %11, %cst_12 {dimension_numbers = #tpu.dot_dimension_numbers<[1], [0], [0], [1], [0, 0, 1, 1], [], []>} : vector<4x8xf32>, vector<8x256xf32>, vector<4x256xf32> -> vector<4x256xf32>
    %c0_13 = arith.constant 0 : index
    %c0_14 = arith.constant 0 : index
    %15 = vector.load %arg6[%c0_13, %c0_14] : memref<4x1xf32, #tpu.memory_space<vmem>>, vector<4x1xf32>
    %16 = vector.broadcast %15 : vector<4x1xf32> to vector<4x256xf32>
    %17 = arith.addf %14, %16 : vector<4x256xf32>
    %cst_15 = arith.constant 0.000000e+00 : f32
    %18 = vector.broadcast %cst_15 : f32 to vector<4x256xf32>
    %19 = arith.maximumf %17, %18 : vector<4x256xf32>
    %c1_i32 = arith.constant 1 : i32
    %20 = tpu.dynamic_rotate %19 by %c1_i32 dim 1 : vector<4x256xf32>, i32 -> vector<4x256xf32>
    %21 = vector.broadcast %0 : vector<1x256xf32> to vector<4x256xf32>
    %22 = arith.mulf %21, %20 : vector<4x256xf32>
    %c255_i32 = arith.constant 255 : i32
    %23 = tpu.dynamic_rotate %19 by %c255_i32 dim 1 : vector<4x256xf32>, i32 -> vector<4x256xf32>
    %24 = vector.broadcast %1 : vector<1x256xf32> to vector<4x256xf32>
    %25 = arith.mulf %24, %23 : vector<4x256xf32>
    %26 = tpu.concatenate %22, %19, %25 in 0 : vector<4x256xf32>, vector<4x256xf32>, vector<4x256xf32> -> vector<12x256xf32>
    %c0_16 = arith.constant 0 : index
    %c0_17 = arith.constant 0 : index
    %27 = vector.load %arg7[%c0_16, %c0_17] : memref<8x12xf32, #tpu.memory_space<vmem>>, vector<8x12xf32>
    %cst_18 = arith.constant dense<0.000000e+00> : vector<8x256xf32>
    %28 = tpu.matmul %27, %26, %cst_18 {dimension_numbers = #tpu.dot_dimension_numbers<[1], [0], [0], [1], [0, 0, 1, 1], [], []>} : vector<8x12xf32>, vector<12x256xf32>, vector<8x256xf32> -> vector<8x256xf32>
    %c0_19 = arith.constant 0 : index
    %c0_20 = arith.constant 0 : index
    %29 = vector.load %arg8[%c0_19, %c0_20] : memref<8x1xf32, #tpu.memory_space<vmem>>, vector<8x1xf32>
    %30 = vector.broadcast %29 : vector<8x1xf32> to vector<8x256xf32>
    %31 = arith.addf %28, %30 : vector<8x256xf32>
    %cst_21 = arith.constant 0.000000e+00 : f32
    %32 = vector.broadcast %cst_21 : f32 to vector<8x256xf32>
    %33 = arith.maximumf %31, %32 : vector<8x256xf32>
    %c0_22 = arith.constant 0 : index
    %c0_23 = arith.constant 0 : index
    %34 = vector.load %arg9[%c0_22, %c0_23] : memref<32x8xf32, #tpu.memory_space<vmem>>, vector<32x8xf32>
    %cst_24 = arith.constant dense<0.000000e+00> : vector<32x256xf32>
    %35 = tpu.matmul %34, %33, %cst_24 {dimension_numbers = #tpu.dot_dimension_numbers<[1], [0], [0], [1], [0, 0, 1, 1], [], []>} : vector<32x8xf32>, vector<8x256xf32>, vector<32x256xf32> -> vector<32x256xf32>
    %c0_25 = arith.constant 0 : index
    %c0_26 = arith.constant 0 : index
    %36 = vector.load %arg10[%c0_25, %c0_26] : memref<32x1xf32, #tpu.memory_space<vmem>>, vector<32x1xf32>
    %37 = vector.broadcast %36 : vector<32x1xf32> to vector<32x256xf32>
    %38 = arith.addf %35, %37 : vector<32x256xf32>
    %cst_27 = arith.constant 0.000000e+00 : f32
    %39 = vector.broadcast %cst_27 : f32 to vector<32x256xf32>
    %40 = arith.maximumf %38, %39 : vector<32x256xf32>
    %cst_28 = arith.constant 0.000000e+00 : f32
    %41 = vector.broadcast %cst_28 : f32 to vector<32x256xf32>
    %42 = arith.maximumf %12, %41 : vector<32x256xf32>
    %43 = arith.addf %40, %42 : vector<32x256xf32>
    %cst_29 = arith.constant 0.000000e+00 : f32
    %44 = vector.broadcast %cst_29 : f32 to vector<32x256xf32>
    %45 = arith.maximumf %43, %44 : vector<32x256xf32>
    %c0_30 = arith.constant 0 : index
    %c0_31 = arith.constant 0 : index
    %c0_32 = arith.constant 0 : index
    %46 = vector.load %arg12[%c0_30, %c0_31, %c0_32] : memref<1x32x256xf32, #tpu.memory_space<vmem>>, vector<1x32x256xf32>
    %47 = vector.shape_cast %46 : vector<1x32x256xf32> to vector<32x256xf32>
    %48 = vector.shape_cast %45 : vector<32x256xf32> to vector<1x32x256xf32>
    tpu.vector_store %arg12[%c0_30, %c0_31, %c0_32], %48 {strides = array<i32>} : memref<1x32x256xf32, #tpu.memory_space<vmem>>, vector<1x32x256xf32>,
    return
  }
  func.func @transform_0(%arg0: i32, %arg1: i32) -> (i32, i32, i32) {
    %c0_i32 = arith.constant 0 : i32
    %c0_i32_0 = arith.constant 0 : i32
    return %arg0, %c0_i32, %arg1 : i32, i32, i32
  }
  func.func @transform_1(%arg0: i32, %arg1: i32) -> (i32, i32) {
    %c0_i32 = arith.constant 0 : i32
    %c0_i32_0 = arith.constant 0 : i32
    %c0_i32_1 = arith.constant 0 : i32
    return %c0_i32, %c0_i32_0 : i32, i32
  }
  func.func @transform_2(%arg0: i32, %arg1: i32) -> (i32, i32) {
    %c0_i32 = arith.constant 0 : i32
    %c0_i32_0 = arith.constant 0 : i32
    %c0_i32_1 = arith.constant 0 : i32
    return %c0_i32, %c0_i32_0 : i32, i32
  }
  func.func @transform_3(%arg0: i32, %arg1: i32) -> (i32, i32) {
    %c0_i32 = arith.constant 0 : i32
    %c0_i32_0 = arith.constant 0 : i32
    %c0_i32_1 = arith.constant 0 : i32
    return %c0_i32, %c0_i32_0 : i32, i32
  }
  func.func @transform_4(%arg0: i32, %arg1: i32) -> (i32, i32) {
    %c0_i32 = arith.constant 0 : i32
    %c0_i32_0 = arith.constant 0 : i32
    %c0_i32_1 = arith.constant 0 : i32
    return %c0_i32, %c0_i32_0 : i32, i32
  }
  func.func @transform_5(%arg0: i32, %arg1: i32) -> (i32, i32) {
    %c0_i32 = arith.constant 0 : i32
    %c0_i32_0 = arith.constant 0 : i32
    %c0_i32_1 = arith.constant 0 : i32
    return %c0_i32, %c0_i32_0 : i32, i32
  }
  func.func @transform_6(%arg0: i32, %arg1: i32) -> (i32, i32) {
    %c0_i32 = arith.constant 0 : i32
    %c0_i32_0 = arith.constant 0 : i32
    %c0_i32_1 = arith.constant 0 : i32
    return %c0_i32, %c0_i32_0 : i32, i32
  }
  func.func @transform_7(%arg0: i32, %arg1: i32) -> (i32, i32) {
    %c0_i32 = arith.constant 0 : i32
    %c0_i32_0 = arith.constant 0 : i32
    %c0_i32_1 = arith.constant 0 : i32
    return %c0_i32, %c0_i32_0 : i32, i32
  }
  func.func @transform_8(%arg0: i32, %arg1: i32) -> (i32, i32) {
    %c0_i32 = arith.constant 0 : i32
    %c0_i32_0 = arith.constant 0 : i32
    %c0_i32_1 = arith.constant 0 : i32
    return %c0_i32, %c0_i32_0 : i32, i32
  }
  func.func @transform_9(%arg0: i32, %arg1: i32) -> (i32, i32) {
    %c0_i32 = arith.constant 0 : i32
    %c0_i32_0 = arith.constant 0 : i32
    %c0_i32_1 = arith.constant 0 : i32
    return %c0_i32, %c0_i32_0 : i32, i32
  }
  func.func @transform_10(%arg0: i32, %arg1: i32) -> (i32, i32, i32) {
    %c0_i32 = arith.constant 0 : i32
    %c0_i32_0 = arith.constant 0 : i32
    return %arg0, %c0_i32, %arg1 : i32, i32, i32
  }
}

</mosaic_0001>

<bundles_post_ra>
// kernel: tpu_custom_call.1
= control target key start
LH: loop header
LB: loop body
LE: loop exit
PB: predicated region body
PF: predicated region fallthrough
CT: control target
= control target key end

     0   :  { %s1346_s0 = inlined_call_operand.vmem [shape: f32[2,16,256], index: 0, kind: input, shape index: {}]   ;;  %s1347_s1 = inlined_call_operand.vmem [shape: f32[40,16], index: 1, kind: input, shape index: {}]   ;;  %s1348_s2 = inlined_call_operand.vmem [shape: f32[40,1], index: 2, kind: input, shape index: {}]   ;;  %s1349_s3 = inlined_call_operand.vmem [shape: f32[4,8], index: 3, kind: input, shape index: {}]   ;;  %s1350_s4 = inlined_call_operand.vmem [shape: f32[4,1], index: 4, kind: input, shape index: {}]   ;;  %s1351_s5 = inlined_call_operand.vmem [shape: f32[8,12], index: 5, kind: input, shape index: {}]   ;;  %s1352_s6 = inlined_call_operand.vmem [shape: f32[8,1], index: 6, kind: input, shape index: {}]   ;;  %s1353_s7 = inlined_call_operand.vmem [shape: f32[32,8], index: 7, kind: input, shape index: {}]   ;;  %s1354_s8 = inlined_call_operand.vmem [shape: f32[32,1], index: 8, kind: input, shape index: {}]   ;;  %s1355_s9 = inlined_call_operand.vmem [shape: f32[2,256], index: 9, kind: input, shape index: {}]   ;;  %s1356_s10 = inlined_call_operand.hbm [shape: f32[2,32,256], index: 10, kind: output, shape index: {}]  }
   0x1   :  { %1357 = sst [smem:[#allocation5_spill]] %s1346_s0 }
   0x2   :  { %15 = vsyncpa [#allocation3], 0 }
   0x3   :  { %17 = vsyncpa [#allocation3 + $0x1], 0  ;;  %s1142_s13 = smov 0   ;;  %s1144_s14 = smov 0  }
   0x4   :  { %s1146_s15 = smov 0   ;;  %s1148_s16 = smov 0  }
   0x5   :  { %s1150_s17 = smov 0   ;;  %s1152_s18 = smov 0  }
   0x6 LB: > { %s899_s19 = sadd.s32 4294967295, %s1080_s18   ;;  %s900_s20 = sadd.s32 4294967294, %s1080_s18   ;;  %s1080_s18 = sphi %s1152_s18, %s23_s18   ;;  %s1076_s17 = sphi %s1150_s17, %s1365_s17   ;;  %s1072_s16 = sphi %s1148_s16, %s1364_s16   ;;  %s1068_s15 = sphi %s1146_s15, %s1363_s15   ;;  %s1064_s14 = sphi %s1144_s14, %s1362_s14   ;;  %s1060_s13 = sphi %s1142_s13, %s1361_s13  }
   0x7   : > { %s35_s21 = sadd.s32 1, %s1076_s17  ;;  %s261_s22 = sadd.s32 1, %s1068_s15 }
   0x8   : > { %p37_p0 = scmp.ge.s32.totalorder %s35_s21, 2  ;;  %p271_p1 = scmp.ne.s32.totalorder %s1068_s15, %s1064_s14 }
   0x9   : > { %p272_p2 = scmp.eq.s32.totalorder %s899_s19, 1  ;;  %p277_p3 = scmp.ne.s32.totalorder %s1064_s14, %s1060_s13 }
   0xa   : > { %s1367_s21 = smov (%p37_p0, %s35_s21), 0  ;;  %p278_p5 = scmp.eq.s32.totalorder %s900_s20, 1 }
   0xb   : > { %p1182_p4 = por %p272_p2, %p271_p1  ;;  %s256_s24 = ssub.s32 %s1076_s17, %s1367_s21 }
   0xc   : > { %p903_p6 = scmp.ge.s32.totalorder %s1080_s18, 1  ;;  %p259_p7 = scmp.eq.s32.totalorder %s256_s24, 0 }
   0xd   : > { %p1189_p8 = por %p278_p5, %p277_p3  ;;  %p336_p9 = scmp.lt.s32.totalorder %s1080_s18, 3 }
   0xe   : > { %s1195_s26 = scalar_select %p259_p7, %s1068_s15, %s261_s22  }
   0xf   : > { %p337_p10 = pnand %p903_p6, %p336_p9 }
  0x10   : > { %p379_p11 = scmp.lt.s32.totalorder (!%p337_p10), %s1072_s16, 1  ;;  %s1360_s0 = sld [smem:[#allocation5_spill]] (!%p337_p10) }
  0x11   : > { %340 = sbr.rel (%p337_p10) target bundleno = 732 (0x2dc), region = 60  ;;  %s1083_s12 = smov (!%p337_p10), 1  }
  0x12   : > { %s938_s22 = sshll.u32 (!%p337_p10), %s1072_s16, 6  ;;  %s1022_s27 = scalar_lea.hbm (!%p337_p10), %s1356_s10, 128 }
  0x13   : > { %s816_s28 = scalar_lea.hbm (!%p337_p10), %s1356_s10, %s938_s22 }
  0x16   : > { %v401_v0 = vld [vmem:[%s1348_s2] sm:$0xff]  ;;  %v1082_v1 = vmov 0   ;;  %s380_s29 = scalar_select %p379_p11, %s1072_s16, 1  ;;  %vm431_vm0 = vcmask 130048   ;;  %v397_v9 = vld [vmem:[%s1347_s1 + $0x8] sm:$0xff]  ;;  %v404_v10 = vld [vmem:[%s1348_s2 + $0x18] sm:$0xff]  ;;  %v570_v30 = vlaneseq }
  0x17   : > { %999 = vset.pattern.permute.xlu0 %v1082_v1  ;;  %1000 = vset.pattern.permute.xlu1 %v1082_v1  ;;  %v514_v6 = vld [vmem:[%s1350_s4] sm:$0xf]  ;;  %v398_v11 = vld [vmem:[%s1347_s1 + $0x10] sm:$0xff]  ;;  %v669_v12 = vld [vmem:[%s1354_s8 + $0x8] sm:$0xff]  ;;  %vm520_vm1 = vcmask 64512   ;;  %vm602_vm4 = vcmask 1043456  }
  0x18   : > { %408 = vperm.xlu0 %999, %v401_v0   ;;  %1001 = vset.pattern.permute.xlu2 %v1082_v1  ;;  %s937_s30 = sshll.u32 %s380_s29, 5  ;;  %v396_v7 = vld [vmem:[%s1347_s1] sm:$0xff]  ;;  %v399_v13 = vld [vmem:[%s1347_s1 + $0x18] sm:$0xff]  ;;  %v571_v31 = vand.u32 127, %v570_v30  ;;  %vm612_vm5 = vcmask 97280   ;;  %v402_v54 = vld [vmem:[%s1348_s2 + $0x8] sm:$0xff] }
  0x19   : > { %s386_s19 = scalar_lea.vmem %s1360_s0, %s937_s30  ;;  %v606_v8 = vld [vmem:[%s1352_s6] sm:$0xff]  ;;  %v670_v57 = vld [vmem:[%s1354_s8 + $0x10] sm:$0xff]  ;;  %s819_s29 = sshll.u32 %s816_s28, 4  ;;  %s820_s29 = int_to_ptr.hbm [resolvable:$true] %s819_s29 }
  0x1a   : > { %v394_v2 = vld [vmem:[%s386_s19 + $0x10] sm:$0xff]  ;;  %v395_v3 = vld [vmem:[%s386_s19 + $0x18] sm:$0xff]  ;;  %v392_v4 = vld [vmem:[%s386_s19] sm:$0xff]  ;;  %vm572_vm2 = vcmp.lt.s32.totalorder %v571_v31, 1  ;;  %vm586_vm3 = vcmp.lt.s32.totalorder %v571_v31, 127  ;;  %s1016_s11 = sshra.s32 %s820_s29, 4  ;;  %s1017_s11 = int_to_ptr.hbm [resolvable:$true] %s1016_s11 }
  0x1b   : > { %461 = vmatpush.msra.mxu0 %v394_v2  ;;  %493 = vmatpush.msra.mxu1 %v395_v3  ;;  %v393_v5 = vld [vmem:[%s386_s19 + $0x8] sm:$0xff]  ;;  %v513_v20 = vld [vmem:[%s1349_s3] sm:$0xf]  ;;  %s1084_s19 = smov 127   ;;  %v403_v58 = vld [vmem:[%s1348_s2 + $0x10] sm:$0xff]  ;;  %p1023_p1 = scmp.lt.s32.totalorder %s1017_s11, %s1356_s10 }
  0x1c   : > { %v389_v33 = vld [vmem:[%s1355_s9] ss:$2 sm:$0x3]  ;;  %v907_v35 = vld [vmem:[%s1355_s9 + $0x1] ss:$2 sm:$0x3] }
  0x1d   : > { %462 = vmatpush.msra.mxu0 %v392_v4  ;;  %494 = vmatpush.msra.mxu1 %v393_v5  ;;  %v576_v36 = vperm.slane %v389_v33, 0  ;;  %v577_v37 = vperm.slane %v389_v33, 1  ;;  %v590_v40 = vperm.slane %v907_v35, 0  ;;  %v591_v41 = vperm.slane %v907_v35, 1  ;;  %v605_v51 = vld [vmem:[%s1351_s5] sm:$0xff]  ;;  %v665_v4 = vld [vmem:[%s1353_s7 + $0x8] sm:$0xff] }
  0x1e   : > { %908 = vmatmul.msk.f32.vlgmr.msra.gmra.mxu0 %vm431_vm0, %v396_v7  ;;  %913 = vmatmul.msk.f32.vlgmr.msra.gmra.mxu1 %vm431_vm0, %v396_v7  ;;  %v400_v55 = vld [vmem:[%s1347_s1 + $0x20] sm:$0xff]  ;;  %v671_v5 = vld [vmem:[%s1354_s8 + $0x18] sm:$0xff] }
  0x1f   : > { %v405_v56 = vld [vmem:[%s1348_s2 + $0x20] sm:$0xff]  ;;  %v667_v7 = vld [vmem:[%s1353_s7 + $0x18] sm:$0xff] }
  0x20   : > { %517 = vperm.xlu0 %999, %v514_v6   ;;  %v664_v2 = vld [vmem:[%s1353_s7] sm:$0xff]  ;;  %v666_v6 = vld [vmem:[%s1353_s7 + $0x10] sm:$0xff] }
  0x21   : > { %v668_v3 = vld [vmem:[%s1354_s8] sm:$0xff] }
  0x26   : > { %909 = vmatmul.msk.f32.gmra.mxu0 %vm431_vm0, %v397_v9  ;;  %914 = vmatmul.msk.f32.gmra.mxu1 %vm431_vm0, %v397_v9 }
  0x28   : > { %609 = vperm.xlu0 %999, %v606_v8  }
  0x2e   : > { %910 = vmatmul.msk.f32.gmra.mxu0 %vm431_vm0, %v398_v11  ;;  %915 = vmatmul.msk.f32.gmra.mxu1 %vm431_vm0, %v398_v11 }
  0x30   : > { %423 = vperm.xlu0 %999, %v404_v10  }
  0x36   : > { %911 = vmatmul.msk.f32.gmra.mxu0 %vm431_vm0, %v399_v13  ;;  %916 = vmatmul.msk.f32.gmra.mxu1 %vm431_vm0, %v399_v13 }
  0x38   : > { %679 = vperm.xlu0 %999, %v669_v12  }
  0x3e   : > { %912 = vmatmul.msk.f32.gmra.mxu0 %vm431_vm0, %v400_v55  ;;  %917 = vmatmul.msk.f32.gmra.mxu1 %vm431_vm0, %v400_v55 }
  0x8a   : > { %v409_v14 = vpop.permute.xlu0 %408 }
  0x92   : > { %v518_v22 = vpop.permute.xlu0 %517 }
  0x9a   : > { %v610_v59 = vpop.permute.xlu0 %609 }
  0x9b   : > { %v464_v15 = vpop.f32.mrf.mxu0  ;;  %v496_v16 = vpop.f32.mrf.mxu1 }
  0x9c   : > { %v465_v17 = vadd.f32 %v464_v15, %v409_v14  ;;  %v497_v18 = vadd.f32 %v496_v16, %v409_v14 }
  0x9e   : > { %v511_v19 = vmax.f32 %v465_v17, 0.0  ;;  %v512_v21 = vmax.f32 %v497_v18, 0.0 }
  0xa0   : > { %539 = vmatpush.msra.mxu2 %v511_v19  ;;  %559 = vmatpush.msra.mxu3 %v512_v21 }
  0xa1   : > { %918 = vmatmul.msk.f32.vlgmr.msra.gmra.mxu2 %vm520_vm1, %v513_v20  ;;  %919 = vmatmul.msk.f32.vlgmr.msra.gmra.mxu3 %vm520_vm1, %v513_v20 }
  0xa2   : > { %v424_v12 = vpop.permute.xlu0 %423 }
  0xa3   : > { %v467_v9 = vpop.f32.mrf.mxu0  ;;  %v499_v10 = vpop.f32.mrf.mxu1 }
  0xaa   : > { %v680_v31 = vpop.permute.xlu0 %679 }
 0x124   : > { %v541_v23 = vpop.f32.mrf.mxu2  ;;  %v561_v26 = vpop.f32.mrf.mxu3 }
 0x125   : > { %v542_v24 = vadd.f32 %v541_v23, %v518_v22  ;;  %v562_v27 = vadd.f32 %v561_v26, %v518_v22  ;;  %v470_v22 = vpop.f32.mrf.mxu0  ;;  %v502_v23 = vpop.f32.mrf.mxu1 }
 0x127   : > { %v564_v25 = vmax.f32 %v542_v24, 0.0  ;;  %v565_v28 = vmax.f32 %v562_v27, 0.0 }
 0x129   : > { %566 = vrot.lane.b32.xlu2 %v564_v25, %s1083_s12  ;;  %582 = vrot.lane.b32.xlu1 %v564_v25, %s1084_s19  ;;  %v598_v49 = vrot.slane %v564_v25, 4  ;;  %v599_v50 = vrot.slane %v565_v28, 4 }
 0x131   : > { %568 = vrot.lane.b32.xlu2 %v565_v28, %s1083_s12  ;;  %584 = vrot.lane.b32.xlu1 %v565_v28, %s1084_s19  ;;  %s375_s12 = sand.u32 1, %s1064_s14  }
 0x132   : > { %s904_s19 = sshll.u32 %s375_s12, 6  ;;  %s803_s30 = scalar_lea.sflag [#allocation3], %s375_s12 }
 0x133   : > { %s1297_s20 = scalar_lea.vmem [#allocation2], %s904_s19  ;;  %s1018_s19 = scalar_lea.hbm %s1017_s11, 64 }
 0x134   : > { %s817_s16 = sshll.u32 %s1297_s20, 4  ;;  %p1019_p12 = scmp.ne.s32.totalorder %s1017_s11, %s1018_s19  ;;  %s818_s16 = int_to_ptr.vmem [resolvable:$true] %s817_s16 }
 0x135   : > { %p1024_p2 = scmp.lt.s32.totalorder %s1022_s27, %s1018_s19 }
 0x136   : > { %p1020_p13 = pnand %p1019_p12, %p1182_p4 }
 0x137   : > { %p1025_p3 = por %p1024_p2, %p1023_p1 }
 0x138   : > { %p1021_p0 = pneg %p1020_p13 }
 0x139   : > { %413 = vperm.xlu1 %1000, %v402_v54   ;;  %418 = vperm.xlu2 %1001, %v403_v58  }
 0x13a   : > { %p1026_p5 = pnand %p1025_p3, %p1021_p0 }
 0x141   : > { %428 = vperm.xlu1 %1000, %v405_v56   ;;  %674 = vperm.xlu2 %1001, %v668_v3  }
 0x149   : > { %684 = vperm.xlu1 %1000, %v670_v57   ;;  %689 = vperm.xlu2 %1001, %v671_v5  }
 0x183   : > { %v567_v29 = vpop.permute.xlu2 %566 }
 0x18b   : > { %v569_v34 = vpop.permute.xlu2 %568 }
 0x18c   : > { %v573_v38 = vsel %vm572_vm2, %v567_v29, %v569_v34  ;;  %v574_v39 = vsel %vm572_vm2, %v569_v34, %v567_v29 }
 0x18d   : > { %v580_v43 = vmul.f32 %v576_v36, %v574_v39  ;;  %v581_v44 = vmul.f32 %v577_v37, %v573_v38 }
 0x18f   : > { %v603_v52 = vsel %vm602_vm4, %v580_v43, %v598_v49  ;;  %v604_v53 = vsel %vm602_vm4, %v581_v44, %v599_v50  ;;  %v505_v43 = vpop.f32.mrf.mxu1 }
 0x193   : > { %v419_v8 = vpop.permute.xlu2 %418 }
 0x194   : > { %v471_v26 = vadd.f32 %v470_v22, %v419_v8  ;;  %v503_v27 = vadd.f32 %v502_v23, %v419_v8 }
 0x196   : > { %v772_v36 = vmax.f32 %v471_v26, 0.0  ;;  %v773_v37 = vmax.f32 %v503_v27, 0.0 }
 0x19b   : > { %v583_v32 = vpop.permute.xlu1 %582  ;;  %v675_v15 = vpop.permute.xlu2 %674 }
 0x1a3   : > { %v585_v42 = vpop.permute.xlu1 %584 }
 0x1a4   : > { %v587_v45 = vsel %vm586_vm3, %v583_v32, %v585_v42  ;;  %v588_v46 = vsel %vm586_vm3, %v585_v42, %v583_v32  ;;  %v473_v42 = vpop.f32.mrf.mxu0 }
 0x1a5   : > { %v594_v47 = vmul.f32 %v590_v40, %v587_v45  ;;  %v595_v48 = vmul.f32 %v591_v41, %v588_v46  ;;  %v474_v46 = vadd.f32 %v473_v42, %v424_v12 }
 0x1a7   : > { %920 = vmatpush.msk.msrb.mxu2 %vm602_vm4, %v594_v47  ;;  %922 = vmatpush.msk.msrb.mxu3 %vm602_vm4, %v595_v48  ;;  %v506_v47 = vadd.f32 %v505_v43, %v424_v12  ;;  %v774_v55 = vmax.f32 %v474_v46, 0.0 }
 0x1a9   : > { %637 = vmatpush.msrb.mxu2 %v603_v52  ;;  %657 = vmatpush.msrb.mxu3 %v604_v53  ;;  %v775_v56 = vmax.f32 %v506_v47, 0.0 }
 0x1aa   : > { %921 = vmatmul.msk.f32.vlgmr.msrb.gmra.mxu2 %vm612_vm5, %v605_v51  ;;  %923 = vmatmul.msk.f32.vlgmr.msrb.gmra.mxu3 %vm612_vm5, %v605_v51 }
 0x1ab   : > { %v414_v11 = vpop.permute.xlu1 %413 }
 0x1ac   : > { %v468_v13 = vadd.f32 %v467_v9, %v414_v11  ;;  %v500_v14 = vadd.f32 %v499_v10, %v414_v11 }
 0x1ae   : > { %v770_v18 = vmax.f32 %v468_v13, 0.0  ;;  %v771_v19 = vmax.f32 %v500_v14, 0.0 }
 0x1b3   : > { %v429_v30 = vpop.permute.xlu1 %428 }
 0x1bb   : > { %v685_v50 = vpop.permute.xlu1 %684 }
 0x22d   : > { %v639_v60 = vpop.f32.mrf.mxu2  ;;  %v659_v61 = vpop.f32.mrf.mxu3 }
 0x22e   : > { %v640_v62 = vadd.f32 %v639_v60, %v610_v59  ;;  %v660_v63 = vadd.f32 %v659_v61, %v610_v59  ;;  %v476_v59 = vpop.f32.mrf.mxu0  ;;  %v508_v60 = vpop.f32.mrf.mxu1 }
 0x230   : > { %v662_v0 = vmax.f32 %v640_v62, 0.0  ;;  %v663_v1 = vmax.f32 %v660_v63, 0.0  ;;  %v477_v63 = vadd.f32 %v476_v59, %v429_v30 }
 0x232   : > { %719 = vmatpush.msra.mxu2 %v662_v0  ;;  %748 = vmatpush.msra.mxu3 %v663_v1  ;;  %v509_v0 = vadd.f32 %v508_v60, %v429_v30  ;;  %v690_v1 = vpop.permute.xlu2 %689  ;;  %v776_v8 = vmax.f32 %v477_v63, 0.0 }
 0x233   : > { %924 = vmatmul.msk.f32.vlgmr.msra.gmra.mxu2 %vm520_vm1, %v664_v2  ;;  %928 = vmatmul.msk.f32.vlgmr.msra.gmra.mxu3 %vm520_vm1, %v664_v2 }
 0x234   : > { %v777_v9 = vmax.f32 %v509_v0, 0.0 }
 0x23b   : > { %925 = vmatmul.msk.f32.gmra.mxu2 %vm520_vm1, %v665_v4  ;;  %929 = vmatmul.msk.f32.gmra.mxu3 %vm520_vm1, %v665_v4 }
 0x243   : > { %926 = vmatmul.msk.f32.gmra.mxu2 %vm520_vm1, %v666_v6  ;;  %930 = vmatmul.msk.f32.gmra.mxu3 %vm520_vm1, %v666_v6 }
 0x24b   : > { %927 = vmatmul.msk.f32.gmra.mxu2 %vm520_vm1, %v667_v7  ;;  %931 = vmatmul.msk.f32.gmra.mxu3 %vm520_vm1, %v667_v7 }
 0x2b6   : > { %v721_v16 = vpop.f32.mrf.mxu2  ;;  %v750_v17 = vpop.f32.mrf.mxu3 }
 0x2b7   : > { %v722_v20 = vadd.f32 %v721_v16, %v675_v15  ;;  %v751_v21 = vadd.f32 %v750_v17, %v675_v15 }
 0x2b9   : > { %v762_v24 = vmax.f32 %v722_v20, 0.0  ;;  %v763_v25 = vmax.f32 %v751_v21, 0.0 }
 0x2bb   : > { %v778_v28 = vadd.f32 %v770_v18, %v762_v24  ;;  %v779_v29 = vadd.f32 %v771_v19, %v763_v25 }
 0x2bd   : > { %v786_v32 = vmax.f32 %v778_v28, 0.0  ;;  %v787_v33 = vmax.f32 %v779_v29, 0.0 }
 0x2be   : > { %v724_v34 = vpop.f32.mrf.mxu2  ;;  %v753_v35 = vpop.f32.mrf.mxu3 }
 0x2bf   : > { %794 = vst [vmem:[%s1297_s20] sm:$0xff] %v786_v32  ;;  %v725_v38 = vadd.f32 %v724_v34, %v680_v31  ;;  %v754_v39 = vadd.f32 %v753_v35, %v680_v31 }
 0x2c0   : > { %795 = vst [vmem:[%s1297_s20 + $0x8] sm:$0xff] %v787_v33 }
 0x2c1   : > { %v764_v40 = vmax.f32 %v725_v38, 0.0  ;;  %v765_v41 = vmax.f32 %v754_v39, 0.0 }
 0x2c3   : > { %v780_v44 = vadd.f32 %v772_v36, %v764_v40  ;;  %v781_v45 = vadd.f32 %v773_v37, %v765_v41 }
 0x2c5   : > { %v788_v48 = vmax.f32 %v780_v44, 0.0  ;;  %v789_v49 = vmax.f32 %v781_v45, 0.0 }
 0x2c6   : > { %v727_v51 = vpop.f32.mrf.mxu2  ;;  %v756_v52 = vpop.f32.mrf.mxu3 }
 0x2c7   : > { %796 = vst [vmem:[%s1297_s20 + $0x10] sm:$0xff] %v788_v48  ;;  %v728_v53 = vadd.f32 %v727_v51, %v685_v50  ;;  %v757_v54 = vadd.f32 %v756_v52, %v685_v50 }
 0x2c8   : > { %797 = vst [vmem:[%s1297_s20 + $0x18] sm:$0xff] %v789_v49 }
 0x2c9   : > { %v766_v57 = vmax.f32 %v728_v53, 0.0  ;;  %v767_v58 = vmax.f32 %v757_v54, 0.0 }
 0x2cb   : > { %v782_v61 = vadd.f32 %v774_v55, %v766_v57  ;;  %v783_v62 = vadd.f32 %v775_v56, %v767_v58 }
 0x2cd   : > { %v790_v2 = vmax.f32 %v782_v61, 0.0  ;;  %v791_v3 = vmax.f32 %v783_v62, 0.0 }
 0x2ce   : > { %v730_v4 = vpop.f32.mrf.mxu2  ;;  %v759_v5 = vpop.f32.mrf.mxu3 }
 0x2cf   : > { %798 = vst [vmem:[%s1297_s20 + $0x20] sm:$0xff] %v790_v2  ;;  %v731_v6 = vadd.f32 %v730_v4, %v690_v1  ;;  %v760_v7 = vadd.f32 %v759_v5, %v690_v1 }
 0x2d0   : > { %799 = vst [vmem:[%s1297_s20 + $0x28] sm:$0xff] %v791_v3 }
 0x2d1   : > { %v768_v10 = vmax.f32 %v731_v6, 0.0  ;;  %v769_v11 = vmax.f32 %v760_v7, 0.0 }
 0x2d3   : > { %v784_v12 = vadd.f32 %v776_v8, %v768_v10  ;;  %v785_v13 = vadd.f32 %v777_v9, %v769_v11 }
 0x2d5   : > { %v792_v14 = vmax.f32 %v784_v12, 0.0  ;;  %v793_v15 = vmax.f32 %v785_v13, 0.0 }
 0x2d7   : > { %800 = vst [vmem:[%s1297_s20 + $0x30] sm:$0xff] %v792_v14 }
 0x2d8   : > { %801 = vst [vmem:[%s1297_s20 + $0x38] sm:$0xff] %v793_v15 }
 0x2d9   : > { %1029 = shalt.err (!%p1026_p5)
}
 0x2da   : > { %s1085_s12 = smov 256   ;;  %s1086_s20 = smov 16  }
 0x2db   : > { %939 = dma.vmem_to_hbm [thread:$0]  (%p1182_p4), %s818_s16, 1024, %s820_s29, %s803_s30, %s1085_s12, %s1085_s12, %s1086_s20  }
 0x2dc PF: > { %p945_p6 = scmp.ge.s32.totalorder %s1080_s18, 2  ;;  %s834_s22 = sand.u32 1, %s1060_s13  }
 0x2dd   : > { %s835_s0 = scalar_lea.sflag [#allocation3], %s834_s22 }
 0x2de   : > { %p942_p7 = pnand %p945_p6, %p1189_p8 }
 0x2e0   : > { %p943_p9 = pneg %p942_p7 }
 0x2e2   : > { %1055 = dma.done.wait (%p943_p9), %s835_s0, 1024  }
 0x2e3   : > { %1057 = vsyncadd (%p943_p9), %s835_s0, 4294966272  ;;  %s23_s18 = sadd.s32 1, %s1080_s18   ;;  %s1361_s13 = smov %s1064_s14 }
 0x2e4   : > { %p20_p10 = scmp.ge.s32.totalorder %s23_s18, 4   ;;  %s1362_s14 = smov %s1068_s15 }
 0x2e5   : > { %s1363_s15 = smov %s1195_s26  ;;  %s1364_s16 = smov %s1076_s17 }
 0x2e6   : > { %s1365_s17 = smov %s1367_s21  ;;  %22 = sbr.rel (!%p20_p10) target bundleno = 6 (0x6), region = 96 }
 0x2eb   :  { %841 = vsyncpa [#allocation3], 1 }
 0x2ec   :  { %843 = vsyncpa [#allocation3 + $0x1], 1 }

</bundles_post_ra>
